<compile_context>
chip_gen: v7x
topology: tpu7x:2x2x1
jax: 0.10.0
libtpu: 0.0.40
codegen_flags: <defaults>
</compile_context>

<pallas_src>
import functools

import jax
import jax.numpy as jnp
from jax.experimental import pallas as pl
from jax.experimental.pallas import tpu as pltpu


def _lstm_step(xg_t, h, c, w_hh, H):
    """One LSTM step. xg_t already holds x_t @ W_ih^T + (b_ih + b_hh).
    Gate order matches PyTorch: i, f, g, o."""
    gates = xg_t + jnp.dot(h, w_hh, preferred_element_type=jnp.float32)  # (B, 4H)
    # sigmoid / tanh on the whole 4H-wide vreg, then slice (1 EUP op each on a
    # full vreg instead of 4 narrow ones).
    sig = jax.nn.sigmoid(gates)
    th = jnp.tanh(gates)
    i_g = sig[:, 0 * H:1 * H]
    f_g = sig[:, 1 * H:2 * H]
    g_g = th[:, 2 * H:3 * H]
    o_g = sig[:, 3 * H:4 * H]
    c_new = f_g * c + i_g * g_g
    h_new = o_g * jnp.tanh(c_new)
    return h_new, c_new


def fused_forward_kernel(
    # inputs
    x_ref,          # (T_enc*B, E)   time-major, flattened encoder input
    enc_wih_ref,    # (E, 4He)
    enc_whh_ref,    # (He, 4He)
    enc_b_ref,      # (1, 4He)       b_ih + b_hh
    he_h_ref,       # (B, He)
    he_c_ref,       # (B, He)
    dec_wih_ref,    # (He, 4Hd)
    dec_whh_ref,    # (Hd, 4Hd)
    dec_b_ref,      # (1, 4Hd)
    hd_h_ref,       # (B, Hd)
    hd_c_ref,       # (B, Hd)
    fc_w_ref,       # (Hd, OPAD)     zero-padded beyond output_dim
    fc_b_ref,       # (1, OPAD)      -1e30-padded beyond output_dim
    # outputs
    out_ref,        # (T_dec*B, OPAD)
    # scratch
    dec_h_scratch,  # VMEM (T_dec*B, Hd)
    *, T_enc, T_dec, B, He, Hd):

    # ---------------- encoder LSTM (only final h is kept) ----------------
    # Hoisted input-to-gate matmul for ALL timesteps + bias (broadcast once).
    xg_all = (jnp.dot(x_ref[...], enc_wih_ref[...],
                      preferred_element_type=jnp.float32)
              + enc_b_ref[...])                                  # (T_enc*B, 4He)
    enc_whh = enc_whh_ref[...]
    h = he_h_ref[...]
    c = he_c_ref[...]
    for t in range(T_enc):                                       # static unroll
        h, c = _lstm_step(xg_all[t * B:(t + 1) * B, :], h, c, enc_whh, He)
    enc_last = h                                                 # (B, He)

    # ---------------- decoder LSTM ----------------
    # Decoder input is enc_last repeated every step -> input-gate term computed ONCE.
    dec_xg = (jnp.dot(enc_last, dec_wih_ref[...],
                      preferred_element_type=jnp.float32)
              + dec_b_ref[...])                                  # (B, 4Hd)
    dec_whh = dec_whh_ref[...]
    h = hd_h_ref[...]
    c = hd_c_ref[...]
    for t in range(T_dec):                                       # static unroll
        h, c = _lstm_step(dec_xg, h, c, dec_whh, Hd)
        dec_h_scratch[t * B:(t + 1) * B, :] = h

    # ---------------- FC + softmax: one lane-dense (T_dec*B, OPAD) slab ----------------
    hd_all = dec_h_scratch[...]                                  # (T_dec*B, Hd)
    logits = (jnp.dot(hd_all, fc_w_ref[...],
                      preferred_element_type=jnp.float32)
              + fc_b_ref[...])                                   # (T_dec*B, OPAD)
    m = jnp.max(logits, axis=-1, keepdims=True)
    e = jnp.exp(logits - m)                                      # padded cols -> exp(-1e30)=0
    s = jnp.sum(e, axis=-1, keepdims=True)
    out_ref[...] = e * pl.reciprocal(s, approx=True)


class AdditionPredictorPallas:
    def __init__(self, key, enc_seqlen, enc_embed_dim, enc_hidden_dim,
                 dec_seqlen, dec_hidden_dim, output_dim):
        self.enc_hidden_dim = enc_hidden_dim
        self.dec_hidden_dim = dec_hidden_dim
        self.dec_seqlen = dec_seqlen
        self.output_dim = output_dim
        # Lane-dense padded output width (multiple of 128).
        self.opad = max(128, ((output_dim + 127) // 128) * 128)

        ks = jax.random.split(key, 10)

        def uniform(k, shape, fan):
            bound = 1.0 / jnp.sqrt(fan)
            return jax.random.uniform(k, shape, jnp.float32, -bound, bound)

        He, Hd = enc_hidden_dim, dec_hidden_dim
        # Encoder LSTM params (stored transposed vs. PyTorch for right-matmul).
        self.enc_w_ih = uniform(ks[0], (enc_embed_dim, 4 * He), He)   # W_ih^T
        self.enc_w_hh = uniform(ks[1], (He, 4 * He), He)              # W_hh^T
        self.enc_b = (uniform(ks[2], (1, 4 * He), He)
                      + uniform(ks[3], (1, 4 * He), He))              # b_ih + b_hh
        # Decoder LSTM params.
        self.dec_w_ih = uniform(ks[4], (He, 4 * Hd), Hd)
        self.dec_w_hh = uniform(ks[5], (Hd, 4 * Hd), Hd)
        self.dec_b = (uniform(ks[6], (1, 4 * Hd), Hd)
                      + uniform(ks[7], (1, 4 * Hd), Hd))
        # Output linear layer (kept unpadded for reference), padded to 128 lanes
        # for the kernel's lane-dense output slab.
        self.fc_w = uniform(ks[8], (Hd, output_dim), Hd)              # W^T
        self.fc_b = uniform(ks[9], (1, output_dim), Hd)
        padw = self.opad - output_dim
        self.fc_w_pad = jnp.pad(self.fc_w, ((0, 0), (0, padw)))                        # zeros
        self.fc_b_pad = jnp.pad(self.fc_b, ((0, 0), (0, padw)), constant_values=-1e30)  # -inf-ish

    def __call__(self, x, state_key):
        # x: (B, enc_seqlen, enc_embed_dim), batch-first like PyTorch.
        B, T_enc, E = x.shape
        T_dec = self.dec_seqlen

        k1, k2, k3, k4 = jax.random.split(state_key, 4)
        # Random initial states, mirroring torch.randn(1, B, H) in forward().
        he_h = jax.random.normal(k1, (B, self.enc_hidden_dim), jnp.float32)
        he_c = jax.random.normal(k2, (B, self.enc_hidden_dim), jnp.float32)
        hd_h = jax.random.normal(k3, (B, self.dec_hidden_dim), jnp.float32)
        hd_c = jax.random.normal(k4, (B, self.dec_hidden_dim), jnp.float32)

        # Time-major flatten (tiny, fused by XLA) so the kernel can hoist x @ W_ih
        # for all timesteps into one matmul.
        x_flat = jnp.transpose(x, (1, 0, 2)).reshape(T_enc * B, E)

        kernel = functools.partial(
            fused_forward_kernel,
            T_enc=T_enc, T_dec=T_dec, B=B,
            He=self.enc_hidden_dim, Hd=self.dec_hidden_dim)

        vmem = pl.BlockSpec(memory_space=pltpu.MemorySpace.VMEM)
        probs_pad = pl.pallas_call(
            kernel,
            out_shape=jax.ShapeDtypeStruct((T_dec * B, self.opad), jnp.float32),
            in_specs=[vmem] * 13,
            out_specs=vmem,
            scratch_shapes=[pltpu.VMEM((T_dec * B, self.dec_hidden_dim),
                                       jnp.float32)],
        )(x_flat,
          self.enc_w_ih, self.enc_w_hh, self.enc_b, he_h, he_c,
          self.dec_w_ih, self.dec_w_hh, self.dec_b, hd_h, hd_c,
          self.fc_w_pad, self.fc_b_pad)

        # (T_dec*B, OPAD) slab -> (B, T_dec, output_dim); tiny fused XLA ops.
        probs = probs_pad.reshape(T_dec, B, self.opad)
        probs = jnp.transpose(probs, (1, 0, 2))[:, :, :self.output_dim]
        return probs


def reference_forward(model, x, state_key):
    """Pure-JAX reference matching the PyTorch module semantics."""
    B, T_enc, _ = x.shape
    He, Hd = model.enc_hidden_dim, model.dec_hidden_dim
    T_dec = model.dec_seqlen

    k1, k2, k3, k4 = jax.random.split(state_key, 4)
    h = jax.random.normal(k1, (B, He), jnp.float32)
    c = jax.random.normal(k2, (B, He), jnp.float32)
    hd_h = jax.random.normal(k3, (B, Hd), jnp.float32)
    hd_c = jax.random.normal(k4, (B, Hd), jnp.float32)

    def step(h, c, xg, w_hh, H):
        gates = xg + jnp.dot(h, w_hh)
        i = jax.nn.sigmoid(gates[:, 0 * H:1 * H])
        f = jax.nn.sigmoid(gates[:, 1 * H:2 * H])
        g = jnp.tanh(gates[:, 2 * H:3 * H])
        o = jax.nn.sigmoid(gates[:, 3 * H:4 * H])
        c = f * c + i * g
        h = o * jnp.tanh(c)
        return h, c

    for t in range(T_enc):
        xg = jnp.dot(x[:, t, :], model.enc_w_ih) + model.enc_b
        h, c = step(h, c, xg, model.enc_w_hh, He)
    enc_last = h

    h, c = hd_h, hd_c
    dec_xg = jnp.dot(enc_last, model.dec_w_ih) + model.dec_b
    outs = []
    for _ in range(T_dec):
        h, c = step(h, c, dec_xg, model.dec_w_hh, Hd)
        logits = jnp.dot(h, model.fc_w) + model.fc_b
        outs.append(jax.nn.softmax(logits, axis=-1))
    return jnp.stack(outs, axis=1)            # (B, T_dec, output_dim)


if __name__ == "__main__":
    enc_seqlen = 8
    enc_embed_dim = 16
    enc_hidden_dim = 32
    dec_seqlen = 4
    dec_hidden_dim = 32
    output_dim = 16
    batch = 2

    key = jax.random.PRNGKey(0)
    k_param, k_x, k_state = jax.random.split(key, 3)

    model = AdditionPredictorPallas(k_param, enc_seqlen, enc_embed_dim,
                                    enc_hidden_dim, dec_seqlen,
                                    dec_hidden_dim, output_dim)

    x = jax.random.normal(k_x, (batch, enc_seqlen, enc_embed_dim), jnp.float32)

    fwd = jax.jit(model.__call__)
    out = fwd(x, k_state)
    out = jax.block_until_ready(out)

    assert out.shape == (batch, dec_seqlen, output_dim)
    assert bool(jnp.all(jnp.isfinite(out)))
    assert bool(jnp.all(out >= 0.0))
    # softmax rows must sum to ~1 (approx reciprocal in the denominator)
    assert jnp.allclose(jnp.sum(out, axis=-1), 1.0, atol=5e-3)

    # Cross-check against pure-JAX reference (loose tol: MXU f32 passes + approx recip).
    ref = jax.block_until_ready(reference_forward(model, x, k_state))
    assert jnp.allclose(out, ref, atol=2e-2), float(jnp.max(jnp.abs(out - ref)))

    print("KERNEL_OK")
</pallas_src>

<mosaic_0001>
module attributes {stable_mosaic.version = 11 : i64} {
  func.func @fused_forward_kernel(%arg0: memref<16x16xf32, #tpu.memory_space<vmem>>, %arg1: memref<16x128xf32, #tpu.memory_space<vmem>>, %arg2: memref<32x128xf32, #tpu.memory_space<vmem>>, %arg3: memref<1x128xf32, #tpu.memory_space<vmem>>, %arg4: memref<2x32xf32, #tpu.memory_space<vmem>>, %arg5: memref<2x32xf32, #tpu.memory_space<vmem>>, %arg6: memref<32x128xf32, #tpu.memory_space<vmem>>, %arg7: memref<32x128xf32, #tpu.memory_space<vmem>>, %arg8: memref<1x128xf32, #tpu.memory_space<vmem>>, %arg9: memref<2x32xf32, #tpu.memory_space<vmem>>, %arg10: memref<2x32xf32, #tpu.memory_space<vmem>>, %arg11: memref<32x128xf32, #tpu.memory_space<vmem>>, %arg12: memref<1x128xf32, #tpu.memory_space<vmem>>, %arg13: memref<8x128xf32, #tpu.memory_space<vmem>>, %arg14: memref<8x32xf32, #tpu.memory_space<vmem>>) attributes {dimension_semantics = [], scalar_prefetch = 0 : i64, scratch_operands = 1 : i64, tpu.core_type = #tpu.core_type<tc>} {
    %c0 = arith.constant 0 : index
    %c0_0 = arith.constant 0 : index
    %0 = vector.load %arg0[%c0, %c0_0] : memref<16x16xf32, #tpu.memory_space<vmem>>, vector<16x16xf32>
    %c0_1 = arith.constant 0 : index
    %c0_2 = arith.constant 0 : index
    %1 = vector.load %arg1[%c0_1, %c0_2] : memref<16x128xf32, #tpu.memory_space<vmem>>, vector<16x128xf32>
    %cst = arith.constant dense<0.000000e+00> : vector<16x128xf32>
    %2 = tpu.matmul %0, %1, %cst {dimension_numbers = #tpu.dot_dimension_numbers<[1], [0], [0], [1], [0, 0, 1, 1], [], []>} : vector<16x16xf32>, vector<16x128xf32>, vector<16x128xf32> -> vector<16x128xf32>
    %c0_3 = arith.constant 0 : index
    %c0_4 = arith.constant 0 : index
    %3 = vector.load %arg3[%c0_3, %c0_4] : memref<1x128xf32, #tpu.memory_space<vmem>>, vector<1x128xf32>
    %4 = vector.broadcast %3 : vector<1x128xf32> to vector<16x128xf32>
    %5 = arith.addf %2, %4 : vector<16x128xf32>
    %c0_5 = arith.constant 0 : index
    %c0_6 = arith.constant 0 : index
    %6 = vector.load %arg2[%c0_5, %c0_6] : memref<32x128xf32, #tpu.memory_space<vmem>>, vector<32x128xf32>
    %c0_7 = arith.constant 0 : index
    %c0_8 = arith.constant 0 : index
    %7 = vector.load %arg4[%c0_7, %c0_8] : memref<2x32xf32, #tpu.memory_space<vmem>>, vector<2x32xf32>
    %c0_9 = arith.constant 0 : index
    %c0_10 = arith.constant 0 : index
    %8 = vector.load %arg5[%c0_9, %c0_10] : memref<2x32xf32, #tpu.memory_space<vmem>>, vector<2x32xf32>
    %9 = vector.extract_strided_slice %5 {offsets = [0, 0], sizes = [2, 128], strides = [1, 1]} : vector<16x128xf32> to vector<2x128xf32>
    %cst_11 = arith.constant dense<0.000000e+00> : vector<2x128xf32>
    %10 = tpu.matmul %7, %6, %cst_11 {dimension_numbers = #tpu.dot_dimension_numbers<[1], [0], [0], [1], [0, 0, 1, 1], [], []>} : vector<2x32xf32>, vector<32x128xf32>, vector<2x128xf32> -> vector<2x128xf32>
    %11 = arith.addf %9, %10 : vector<2x128xf32>
    %12 = arith.negf %11 : vector<2x128xf32>
    %13 = math.exp %12 : vector<2x128xf32>
    %cst_12 = arith.constant 1.000000e+00 : f32
    %14 = vector.broadcast %cst_12 : f32 to vector<2x128xf32>
    %15 = arith.addf %14, %13 : vector<2x128xf32>
    %16 = arith.divf %14, %15 : vector<2x128xf32>
    %17 = math.tanh %11 : vector<2x128xf32>
    %18 = vector.extract_strided_slice %16 {offsets = [0, 0], sizes = [2, 32], strides = [1, 1]} : vector<2x128xf32> to vector<2x32xf32>
    %19 = vector.extract_strided_slice %16 {offsets = [0, 32], sizes = [2, 32], strides = [1, 1]} : vector<2x128xf32> to vector<2x32xf32>
    %20 = vector.extract_strided_slice %17 {offsets = [0, 64], sizes = [2, 32], strides = [1, 1]} : vector<2x128xf32> to vector<2x32xf32>
    %21 = vector.extract_strided_slice %16 {offsets = [0, 96], sizes = [2, 32], strides = [1, 1]} : vector<2x128xf32> to vector<2x32xf32>
    %22 = arith.mulf %19, %8 : vector<2x32xf32>
    %23 = arith.mulf %18, %20 : vector<2x32xf32>
    %24 = arith.addf %22, %23 : vector<2x32xf32>
    %25 = math.tanh %24 : vector<2x32xf32>
    %26 = arith.mulf %21, %25 : vector<2x32xf32>
    %27 = vector.extract_strided_slice %5 {offsets = [2, 0], sizes = [2, 128], strides = [1, 1]} : vector<16x128xf32> to vector<2x128xf32>
    %cst_13 = arith.constant dense<0.000000e+00> : vector<2x128xf32>
    %28 = tpu.matmul %26, %6, %cst_13 {dimension_numbers = #tpu.dot_dimension_numbers<[1], [0], [0], [1], [0, 0, 1, 1], [], []>} : vector<2x32xf32>, vector<32x128xf32>, vector<2x128xf32> -> vector<2x128xf32>
    %29 = arith.addf %27, %28 : vector<2x128xf32>
    %30 = arith.negf %29 : vector<2x128xf32>
    %31 = math.exp %30 : vector<2x128xf32>
    %cst_14 = arith.constant 1.000000e+00 : f32
    %32 = vector.broadcast %cst_14 : f32 to vector<2x128xf32>
    %33 = arith.addf %32, %31 : vector<2x128xf32>
    %34 = arith.divf %32, %33 : vector<2x128xf32>
    %35 = math.tanh %29 : vector<2x128xf32>
    %36 = vector.extract_strided_slice %34 {offsets = [0, 0], sizes = [2, 32], strides = [1, 1]} : vector<2x128xf32> to vector<2x32xf32>
    %37 = vector.extract_strided_slice %34 {offsets = [0, 32], sizes = [2, 32], strides = [1, 1]} : vector<2x128xf32> to vector<2x32xf32>
    %38 = vector.extract_strided_slice %35 {offsets = [0, 64], sizes = [2, 32], strides = [1, 1]} : vector<2x128xf32> to vector<2x32xf32>
    %39 = vector.extract_strided_slice %34 {offsets = [0, 96], sizes = [2, 32], strides = [1, 1]} : vector<2x128xf32> to vector<2x32xf32>
    %40 = arith.mulf %37, %24 : vector<2x32xf32>
    %41 = arith.mulf %36, %38 : vector<2x32xf32>
    %42 = arith.addf %40, %41 : vector<2x32xf32>
    %43 = math.tanh %42 : vector<2x32xf32>
    %44 = arith.mulf %39, %43 : vector<2x32xf32>
    %45 = vector.extract_strided_slice %5 {offsets = [4, 0], sizes = [2, 128], strides = [1, 1]} : vector<16x128xf32> to vector<2x128xf32>
    %cst_15 = arith.constant dense<0.000000e+00> : vector<2x128xf32>
    %46 = tpu.matmul %44, %6, %cst_15 {dimension_numbers = #tpu.dot_dimension_numbers<[1], [0], [0], [1], [0, 0, 1, 1], [], []>} : vector<2x32xf32>, vector<32x128xf32>, vector<2x128xf32> -> vector<2x128xf32>
    %47 = arith.addf %45, %46 : vector<2x128xf32>
    %48 = arith.negf %47 : vector<2x128xf32>
    %49 = math.exp %48 : vector<2x128xf32>
    %cst_16 = arith.constant 1.000000e+00 : f32
    %50 = vector.broadcast %cst_16 : f32 to vector<2x128xf32>
    %51 = arith.addf %50, %49 : vector<2x128xf32>
    %52 = arith.divf %50, %51 : vector<2x128xf32>
    %53 = math.tanh %47 : vector<2x128xf32>
    %54 = vector.extract_strided_slice %52 {offsets = [0, 0], sizes = [2, 32], strides = [1, 1]} : vector<2x128xf32> to vector<2x32xf32>
    %55 = vector.extract_strided_slice %52 {offsets = [0, 32], sizes = [2, 32], strides = [1, 1]} : vector<2x128xf32> to vector<2x32xf32>
    %56 = vector.extract_strided_slice %53 {offsets = [0, 64], sizes = [2, 32], strides = [1, 1]} : vector<2x128xf32> to vector<2x32xf32>
    %57 = vector.extract_strided_slice %52 {offsets = [0, 96], sizes = [2, 32], strides = [1, 1]} : vector<2x128xf32> to vector<2x32xf32>
    %58 = arith.mulf %55, %42 : vector<2x32xf32>
    %59 = arith.mulf %54, %56 : vector<2x32xf32>
    %60 = arith.addf %58, %59 : vector<2x32xf32>
    %61 = math.tanh %60 : vector<2x32xf32>
    %62 = arith.mulf %57, %61 : vector<2x32xf32>
    %63 = vector.extract_strided_slice %5 {offsets = [6, 0], sizes = [2, 128], strides = [1, 1]} : vector<16x128xf32> to vector<2x128xf32>
    %cst_17 = arith.constant dense<0.000000e+00> : vector<2x128xf32>
    %64 = tpu.matmul %62, %6, %cst_17 {dimension_numbers = #tpu.dot_dimension_numbers<[1], [0], [0], [1], [0, 0, 1, 1], [], []>} : vector<2x32xf32>, vector<32x128xf32>, vector<2x128xf32> -> vector<2x128xf32>
    %65 = arith.addf %63, %64 : vector<2x128xf32>
    %66 = arith.negf %65 : vector<2x128xf32>
    %67 = math.exp %66 : vector<2x128xf32>
    %cst_18 = arith.constant 1.000000e+00 : f32
    %68 = vector.broadcast %cst_18 : f32 to vector<2x128xf32>
    %69 = arith.addf %68, %67 : vector<2x128xf32>
    %70 = arith.divf %68, %69 : vector<2x128xf32>
    %71 = math.tanh %65 : vector<2x128xf32>
    %72 = vector.extract_strided_slice %70 {offsets = [0, 0], sizes = [2, 32], strides = [1, 1]} : vector<2x128xf32> to vector<2x32xf32>
    %73 = vector.extract_strided_slice %70 {offsets = [0, 32], sizes = [2, 32], strides = [1, 1]} : vector<2x128xf32> to vector<2x32xf32>
    %74 = vector.extract_strided_slice %71 {offsets = [0, 64], sizes = [2, 32], strides = [1, 1]} : vector<2x128xf32> to vector<2x32xf32>
    %75 = vector.extract_strided_slice %70 {offsets = [0, 96], sizes = [2, 32], strides = [1, 1]} : vector<2x128xf32> to vector<2x32xf32>
    %76 = arith.mulf %73, %60 : vector<2x32xf32>
    %77 = arith.mulf %72, %74 : vector<2x32xf32>
    %78 = arith.addf %76, %77 : vector<2x32xf32>
    %79 = math.tanh %78 : vector<2x32xf32>
    %80 = arith.mulf %75, %79 : vector<2x32xf32>
    %81 = vector.extract_strided_slice %5 {offsets = [8, 0], sizes = [2, 128], strides = [1, 1]} : vector<16x128xf32> to vector<2x128xf32>
    %cst_19 = arith.constant dense<0.000000e+00> : vector<2x128xf32>
    %82 = tpu.matmul %80, %6, %cst_19 {dimension_numbers = #tpu.dot_dimension_numbers<[1], [0], [0], [1], [0, 0, 1, 1], [], []>} : vector<2x32xf32>, vector<32x128xf32>, vector<2x128xf32> -> vector<2x128xf32>
    %83 = arith.addf %81, %82 : vector<2x128xf32>
    %84 = arith.negf %83 : vector<2x128xf32>
    %85 = math.exp %84 : vector<2x128xf32>
    %cst_20 = arith.constant 1.000000e+00 : f32
    %86 = vector.broadcast %cst_20 : f32 to vector<2x128xf32>
    %87 = arith.addf %86, %85 : vector<2x128xf32>
    %88 = arith.divf %86, %87 : vector<2x128xf32>
    %89 = math.tanh %83 : vector<2x128xf32>
    %90 = vector.extract_strided_slice %88 {offsets = [0, 0], sizes = [2, 32], strides = [1, 1]} : vector<2x128xf32> to vector<2x32xf32>
    %91 = vector.extract_strided_slice %88 {offsets = [0, 32], sizes = [2, 32], strides = [1, 1]} : vector<2x128xf32> to vector<2x32xf32>
    %92 = vector.extract_strided_slice %89 {offsets = [0, 64], sizes = [2, 32], strides = [1, 1]} : vector<2x128xf32> to vector<2x32xf32>
    %93 = vector.extract_strided_slice %88 {offsets = [0, 96], sizes = [2, 32], strides = [1, 1]} : vector<2x128xf32> to vector<2x32xf32>
    %94 = arith.mulf %91, %78 : vector<2x32xf32>
    %95 = arith.mulf %90, %92 : vector<2x32xf32>
    %96 = arith.addf %94, %95 : vector<2x32xf32>
    %97 = math.tanh %96 : vector<2x32xf32>
    %98 = arith.mulf %93, %97 : vector<2x32xf32>
    %99 = vector.extract_strided_slice %5 {offsets = [10, 0], sizes = [2, 128], strides = [1, 1]} : vector<16x128xf32> to vector<2x128xf32>
    %cst_21 = arith.constant dense<0.000000e+00> : vector<2x128xf32>
    %100 = tpu.matmul %98, %6, %cst_21 {dimension_numbers = #tpu.dot_dimension_numbers<[1], [0], [0], [1], [0, 0, 1, 1], [], []>} : vector<2x32xf32>, vector<32x128xf32>, vector<2x128xf32> -> vector<2x128xf32>
    %101 = arith.addf %99, %100 : vector<2x128xf32>
    %102 = arith.negf %101 : vector<2x128xf32>
    %103 = math.exp %102 : vector<2x128xf32>
    %cst_22 = arith.constant 1.000000e+00 : f32
    %104 = vector.broadcast %cst_22 : f32 to vector<2x128xf32>
    %105 = arith.addf %104, %103 : vector<2x128xf32>
    %106 = arith.divf %104, %105 : vector<2x128xf32>
    %107 = math.tanh %101 : vector<2x128xf32>
    %108 = vector.extract_strided_slice %106 {offsets = [0, 0], sizes = [2, 32], strides = [1, 1]} : vector<2x128xf32> to vector<2x32xf32>
    %109 = vector.extract_strided_slice %106 {offsets = [0, 32], sizes = [2, 32], strides = [1, 1]} : vector<2x128xf32> to vector<2x32xf32>
    %110 = vector.extract_strided_slice %107 {offsets = [0, 64], sizes = [2, 32], strides = [1, 1]} : vector<2x128xf32> to vector<2x32xf32>
    %111 = vector.extract_strided_slice %106 {offsets = [0, 96], sizes = [2, 32], strides = [1, 1]} : vector<2x128xf32> to vector<2x32xf32>
    %112 = arith.mulf %109, %96 : vector<2x32xf32>
    %113 = arith.mulf %108, %110 : vector<2x32xf32>
    %114 = arith.addf %112, %113 : vector<2x32xf32>
    %115 = math.tanh %114 : vector<2x32xf32>
    %116 = arith.mulf %111, %115 : vector<2x32xf32>
    %117 = vector.extract_strided_slice %5 {offsets = [12, 0], sizes = [2, 128], strides = [1, 1]} : vector<16x128xf32> to vector<2x128xf32>
    %cst_23 = arith.constant dense<0.000000e+00> : vector<2x128xf32>
    %118 = tpu.matmul %116, %6, %cst_23 {dimension_numbers = #tpu.dot_dimension_numbers<[1], [0], [0], [1], [0, 0, 1, 1], [], []>} : vector<2x32xf32>, vector<32x128xf32>, vector<2x128xf32> -> vector<2x128xf32>
    %119 = arith.addf %117, %118 : vector<2x128xf32>
    %120 = arith.negf %119 : vector<2x128xf32>
    %121 = math.exp %120 : vector<2x128xf32>
    %cst_24 = arith.constant 1.000000e+00 : f32
    %122 = vector.broadcast %cst_24 : f32 to vector<2x128xf32>
    %123 = arith.addf %122, %121 : vector<2x128xf32>
    %124 = arith.divf %122, %123 : vector<2x128xf32>
    %125 = math.tanh %119 : vector<2x128xf32>
    %126 = vector.extract_strided_slice %124 {offsets = [0, 0], sizes = [2, 32], strides = [1, 1]} : vector<2x128xf32> to vector<2x32xf32>
    %127 = vector.extract_strided_slice %124 {offsets = [0, 32], sizes = [2, 32], strides = [1, 1]} : vector<2x128xf32> to vector<2x32xf32>
    %128 = vector.extract_strided_slice %125 {offsets = [0, 64], sizes = [2, 32], strides = [1, 1]} : vector<2x128xf32> to vector<2x32xf32>
    %129 = vector.extract_strided_slice %124 {offsets = [0, 96], sizes = [2, 32], strides = [1, 1]} : vector<2x128xf32> to vector<2x32xf32>
    %130 = arith.mulf %127, %114 : vector<2x32xf32>
    %131 = arith.mulf %126, %128 : vector<2x32xf32>
    %132 = arith.addf %130, %131 : vector<2x32xf32>
    %133 = math.tanh %132 : vector<2x32xf32>
    %134 = arith.mulf %129, %133 : vector<2x32xf32>
    %135 = vector.extract_strided_slice %5 {offsets = [14, 0], sizes = [2, 128], strides = [1, 1]} : vector<16x128xf32> to vector<2x128xf32>
    %cst_25 = arith.constant dense<0.000000e+00> : vector<2x128xf32>
    %136 = tpu.matmul %134, %6, %cst_25 {dimension_numbers = #tpu.dot_dimension_numbers<[1], [0], [0], [1], [0, 0, 1, 1], [], []>} : vector<2x32xf32>, vector<32x128xf32>, vector<2x128xf32> -> vector<2x128xf32>
    %137 = arith.addf %135, %136 : vector<2x128xf32>
    %138 = arith.negf %137 : vector<2x128xf32>
    %139 = math.exp %138 : vector<2x128xf32>
    %cst_26 = arith.constant 1.000000e+00 : f32
    %140 = vector.broadcast %cst_26 : f32 to vector<2x128xf32>
    %141 = arith.addf %140, %139 : vector<2x128xf32>
    %142 = arith.divf %140, %141 : vector<2x128xf32>
    %143 = math.tanh %137 : vector<2x128xf32>
    %144 = vector.extract_strided_slice %142 {offsets = [0, 0], sizes = [2, 32], strides = [1, 1]} : vector<2x128xf32> to vector<2x32xf32>
    %145 = vector.extract_strided_slice %142 {offsets = [0, 32], sizes = [2, 32], strides = [1, 1]} : vector<2x128xf32> to vector<2x32xf32>
    %146 = vector.extract_strided_slice %143 {offsets = [0, 64], sizes = [2, 32], strides = [1, 1]} : vector<2x128xf32> to vector<2x32xf32>
    %147 = vector.extract_strided_slice %142 {offsets = [0, 96], sizes = [2, 32], strides = [1, 1]} : vector<2x128xf32> to vector<2x32xf32>
    %148 = arith.mulf %145, %132 : vector<2x32xf32>
    %149 = arith.mulf %144, %146 : vector<2x32xf32>
    %150 = arith.addf %148, %149 : vector<2x32xf32>
    %151 = math.tanh %150 : vector<2x32xf32>
    %152 = arith.mulf %147, %151 : vector<2x32xf32>
    %c0_27 = arith.constant 0 : index
    %c0_28 = arith.constant 0 : index
    %153 = vector.load %arg6[%c0_27, %c0_28] : memref<32x128xf32, #tpu.memory_space<vmem>>, vector<32x128xf32>
    %cst_29 = arith.constant dense<0.000000e+00> : vector<2x128xf32>
    %154 = tpu.matmul %152, %153, %cst_29 {dimension_numbers = #tpu.dot_dimension_numbers<[1], [0], [0], [1], [0, 0, 1, 1], [], []>} : vector<2x32xf32>, vector<32x128xf32>, vector<2x128xf32> -> vector<2x128xf32>
    %c0_30 = arith.constant 0 : index
    %c0_31 = arith.constant 0 : index
    %155 = vector.load %arg8[%c0_30, %c0_31] : memref<1x128xf32, #tpu.memory_space<vmem>>, vector<1x128xf32>
    %156 = vector.broadcast %155 : vector<1x128xf32> to vector<2x128xf32>
    %157 = arith.addf %154, %156 : vector<2x128xf32>
    %c0_32 = arith.constant 0 : index
    %c0_33 = arith.constant 0 : index
    %158 = vector.load %arg7[%c0_32, %c0_33] : memref<32x128xf32, #tpu.memory_space<vmem>>, vector<32x128xf32>
    %c0_34 = arith.constant 0 : index
    %c0_35 = arith.constant 0 : index
    %159 = vector.load %arg9[%c0_34, %c0_35] : memref<2x32xf32, #tpu.memory_space<vmem>>, vector<2x32xf32>
    %c0_36 = arith.constant 0 : index
    %c0_37 = arith.constant 0 : index
    %160 = vector.load %arg10[%c0_36, %c0_37] : memref<2x32xf32, #tpu.memory_space<vmem>>, vector<2x32xf32>
    %cst_38 = arith.constant dense<0.000000e+00> : vector<2x128xf32>
    %161 = tpu.matmul %159, %158, %cst_38 {dimension_numbers = #tpu.dot_dimension_numbers<[1], [0], [0], [1], [0, 0, 1, 1], [], []>} : vector<2x32xf32>, vector<32x128xf32>, vector<2x128xf32> -> vector<2x128xf32>
    %162 = arith.addf %157, %161 : vector<2x128xf32>
    %163 = arith.negf %162 : vector<2x128xf32>
    %164 = math.exp %163 : vector<2x128xf32>
    %cst_39 = arith.constant 1.000000e+00 : f32
    %165 = vector.broadcast %cst_39 : f32 to vector<2x128xf32>
    %166 = arith.addf %165, %164 : vector<2x128xf32>
    %167 = arith.divf %165, %166 : vector<2x128xf32>
    %168 = math.tanh %162 : vector<2x128xf32>
    %169 = vector.extract_strided_slice %167 {offsets = [0, 0], sizes = [2, 32], strides = [1, 1]} : vector<2x128xf32> to vector<2x32xf32>
    %170 = vector.extract_strided_slice %167 {offsets = [0, 32], sizes = [2, 32], strides = [1, 1]} : vector<2x128xf32> to vector<2x32xf32>
    %171 = vector.extract_strided_slice %168 {offsets = [0, 64], sizes = [2, 32], strides = [1, 1]} : vector<2x128xf32> to vector<2x32xf32>
    %172 = vector.extract_strided_slice %167 {offsets = [0, 96], sizes = [2, 32], strides = [1, 1]} : vector<2x128xf32> to vector<2x32xf32>
    %173 = arith.mulf %170, %160 : vector<2x32xf32>
    %174 = arith.mulf %169, %171 : vector<2x32xf32>
    %175 = arith.addf %173, %174 : vector<2x32xf32>
    %176 = math.tanh %175 : vector<2x32xf32>
    %177 = arith.mulf %172, %176 : vector<2x32xf32>
    %c0_40 = arith.constant 0 : index
    %c0_41 = arith.constant 0 : index
    %178 = vector.load %arg14[%c0_40, %c0_41] : memref<8x32xf32, #tpu.memory_space<vmem>>, vector<2x32xf32>
    tpu.vector_store %arg14[%c0_40, %c0_41], %177 {strides = array<i32>} : memref<8x32xf32, #tpu.memory_space<vmem>>, vector<2x32xf32>,
    %cst_42 = arith.constant dense<0.000000e+00> : vector<2x128xf32>
    %179 = tpu.matmul %177, %158, %cst_42 {dimension_numbers = #tpu.dot_dimension_numbers<[1], [0], [0], [1], [0, 0, 1, 1], [], []>} : vector<2x32xf32>, vector<32x128xf32>, vector<2x128xf32> -> vector<2x128xf32>
    %180 = arith.addf %157, %179 : vector<2x128xf32>
    %181 = arith.negf %180 : vector<2x128xf32>
    %182 = math.exp %181 : vector<2x128xf32>
    %cst_43 = arith.constant 1.000000e+00 : f32
    %183 = vector.broadcast %cst_43 : f32 to vector<2x128xf32>
    %184 = arith.addf %183, %182 : vector<2x128xf32>
    %185 = arith.divf %183, %184 : vector<2x128xf32>
    %186 = math.tanh %180 : vector<2x128xf32>
    %187 = vector.extract_strided_slice %185 {offsets = [0, 0], sizes = [2, 32], strides = [1, 1]} : vector<2x128xf32> to vector<2x32xf32>
    %188 = vector.extract_strided_slice %185 {offsets = [0, 32], sizes = [2, 32], strides = [1, 1]} : vector<2x128xf32> to vector<2x32xf32>
    %189 = vector.extract_strided_slice %186 {offsets = [0, 64], sizes = [2, 32], strides = [1, 1]} : vector<2x128xf32> to vector<2x32xf32>
    %190 = vector.extract_strided_slice %185 {offsets = [0, 96], sizes = [2, 32], strides = [1, 1]} : vector<2x128xf32> to vector<2x32xf32>
    %191 = arith.mulf %188, %175 : vector<2x32xf32>
    %192 = arith.mulf %187, %189 : vector<2x32xf32>
    %193 = arith.addf %191, %192 : vector<2x32xf32>
    %194 = math.tanh %193 : vector<2x32xf32>
    %195 = arith.mulf %190, %194 : vector<2x32xf32>
    %c2 = arith.constant 2 : index
    %c0_44 = arith.constant 0 : index
    %196 = vector.load %arg14[%c2, %c0_44] : memref<8x32xf32, #tpu.memory_space<vmem>>, vector<2x32xf32>
    tpu.vector_store %arg14[%c2, %c0_44], %195 {strides = array<i32>} : memref<8x32xf32, #tpu.memory_space<vmem>>, vector<2x32xf32>,
    %cst_45 = arith.constant dense<0.000000e+00> : vector<2x128xf32>
    %197 = tpu.matmul %195, %158, %cst_45 {dimension_numbers = #tpu.dot_dimension_numbers<[1], [0], [0], [1], [0, 0, 1, 1], [], []>} : vector<2x32xf32>, vector<32x128xf32>, vector<2x128xf32> -> vector<2x128xf32>
    %198 = arith.addf %157, %197 : vector<2x128xf32>
    %199 = arith.negf %198 : vector<2x128xf32>
    %200 = math.exp %199 : vector<2x128xf32>
    %cst_46 = arith.constant 1.000000e+00 : f32
    %201 = vector.broadcast %cst_46 : f32 to vector<2x128xf32>
    %202 = arith.addf %201, %200 : vector<2x128xf32>
    %203 = arith.divf %201, %202 : vector<2x128xf32>
    %204 = math.tanh %198 : vector<2x128xf32>
    %205 = vector.extract_strided_slice %203 {offsets = [0, 0], sizes = [2, 32], strides = [1, 1]} : vector<2x128xf32> to vector<2x32xf32>
    %206 = vector.extract_strided_slice %203 {offsets = [0, 32], sizes = [2, 32], strides = [1, 1]} : vector<2x128xf32> to vector<2x32xf32>
    %207 = vector.extract_strided_slice %204 {offsets = [0, 64], sizes = [2, 32], strides = [1, 1]} : vector<2x128xf32> to vector<2x32xf32>
    %208 = vector.extract_strided_slice %203 {offsets = [0, 96], sizes = [2, 32], strides = [1, 1]} : vector<2x128xf32> to vector<2x32xf32>
    %209 = arith.mulf %206, %193 : vector<2x32xf32>
    %210 = arith.mulf %205, %207 : vector<2x32xf32>
    %211 = arith.addf %209, %210 : vector<2x32xf32>
    %212 = math.tanh %211 : vector<2x32xf32>
    %213 = arith.mulf %208, %212 : vector<2x32xf32>
    %c4 = arith.constant 4 : index
    %c0_47 = arith.constant 0 : index
    %214 = vector.load %arg14[%c4, %c0_47] : memref<8x32xf32, #tpu.memory_space<vmem>>, vector<2x32xf32>
    tpu.vector_store %arg14[%c4, %c0_47], %213 {strides = array<i32>} : memref<8x32xf32, #tpu.memory_space<vmem>>, vector<2x32xf32>,
    %cst_48 = arith.constant dense<0.000000e+00> : vector<2x128xf32>
    %215 = tpu.matmul %213, %158, %cst_48 {dimension_numbers = #tpu.dot_dimension_numbers<[1], [0], [0], [1], [0, 0, 1, 1], [], []>} : vector<2x32xf32>, vector<32x128xf32>, vector<2x128xf32> -> vector<2x128xf32>
    %216 = arith.addf %157, %215 : vector<2x128xf32>
    %217 = arith.negf %216 : vector<2x128xf32>
    %218 = math.exp %217 : vector<2x128xf32>
    %cst_49 = arith.constant 1.000000e+00 : f32
    %219 = vector.broadcast %cst_49 : f32 to vector<2x128xf32>
    %220 = arith.addf %219, %218 : vector<2x128xf32>
    %221 = arith.divf %219, %220 : vector<2x128xf32>
    %222 = math.tanh %216 : vector<2x128xf32>
    %223 = vector.extract_strided_slice %221 {offsets = [0, 0], sizes = [2, 32], strides = [1, 1]} : vector<2x128xf32> to vector<2x32xf32>
    %224 = vector.extract_strided_slice %221 {offsets = [0, 32], sizes = [2, 32], strides = [1, 1]} : vector<2x128xf32> to vector<2x32xf32>
    %225 = vector.extract_strided_slice %222 {offsets = [0, 64], sizes = [2, 32], strides = [1, 1]} : vector<2x128xf32> to vector<2x32xf32>
    %226 = vector.extract_strided_slice %221 {offsets = [0, 96], sizes = [2, 32], strides = [1, 1]} : vector<2x128xf32> to vector<2x32xf32>
    %227 = arith.mulf %224, %211 : vector<2x32xf32>
    %228 = arith.mulf %223, %225 : vector<2x32xf32>
    %229 = arith.addf %227, %228 : vector<2x32xf32>
    %230 = math.tanh %229 : vector<2x32xf32>
    %231 = arith.mulf %226, %230 : vector<2x32xf32>
    %c6 = arith.constant 6 : index
    %c0_50 = arith.constant 0 : index
    %232 = vector.load %arg14[%c6, %c0_50] : memref<8x32xf32, #tpu.memory_space<vmem>>, vector<2x32xf32>
    tpu.vector_store %arg14[%c6, %c0_50], %231 {strides = array<i32>} : memref<8x32xf32, #tpu.memory_space<vmem>>, vector<2x32xf32>,
    %c0_51 = arith.constant 0 : index
    %c0_52 = arith.constant 0 : index
    %233 = vector.load %arg14[%c0_51, %c0_52] : memref<8x32xf32, #tpu.memory_space<vmem>>, vector<8x32xf32>
    %c0_53 = arith.constant 0 : index
    %c0_54 = arith.constant 0 : index
    %234 = vector.load %arg11[%c0_53, %c0_54] : memref<32x128xf32, #tpu.memory_space<vmem>>, vector<32x128xf32>
    %cst_55 = arith.constant dense<0.000000e+00> : vector<8x128xf32>
    %235 = tpu.matmul %233, %234, %cst_55 {dimension_numbers = #tpu.dot_dimension_numbers<[1], [0], [0], [1], [0, 0, 1, 1], [], []>} : vector<8x32xf32>, vector<32x128xf32>, vector<8x128xf32> -> vector<8x128xf32>
    %c0_56 = arith.constant 0 : index
    %c0_57 = arith.constant 0 : index
    %236 = vector.load %arg12[%c0_56, %c0_57] : memref<1x128xf32, #tpu.memory_space<vmem>>, vector<1x128xf32>
    %237 = vector.broadcast %236 : vector<1x128xf32> to vector<8x128xf32>
    %238 = arith.addf %235, %237 : vector<8x128xf32>
    %cst_58 = arith.constant dense<0xFF800000> : vector<8xf32>
    %239 = vector.multi_reduction <maximumf>, %238, %cst_58 [1] : vector<8x128xf32> to vector<8xf32>
    %240 = vector.shape_cast %239 : vector<8xf32> to vector<8x1xf32>
    %241 = vector.broadcast %240 : vector<8x1xf32> to vector<8x128xf32>
    %242 = arith.subf %238, %241 : vector<8x128xf32>
    %243 = math.exp %242 : vector<8x128xf32>
    %cst_59 = arith.constant dense<0.000000e+00> : vector<8xf32>
    %244 = vector.multi_reduction <add>, %243, %cst_59 [1] : vector<8x128xf32> to vector<8xf32>
    %245 = vector.shape_cast %244 : vector<8xf32> to vector<8x1xf32>
    %246 = tpu.reciprocal %245 {approx = true} : vector<8x1xf32> -> vector<8x1xf32>
    %247 = vector.broadcast %246 : vector<8x1xf32> to vector<8x128xf32>
    %248 = arith.mulf %243, %247 : vector<8x128xf32>
    %c0_60 = arith.constant 0 : index
    %c0_61 = arith.constant 0 : index
    %249 = vector.load %arg13[%c0_60, %c0_61] : memref<8x128xf32, #tpu.memory_space<vmem>>, vector<8x128xf32>
    tpu.vector_store %arg13[%c0_60, %c0_61], %248 {strides = array<i32>} : memref<8x128xf32, #tpu.memory_space<vmem>>, vector<8x128xf32>,
    return
  }
}

</mosaic_0001>

<bundles_post_ra>
// kernel: a_call__.1
= control target key start
LH: loop header
LB: loop body
LE: loop exit
PB: predicated region body
PF: predicated region fallthrough
CT: control target
= control target key end

     0   :  { %vm55_vm0 = vcmask 130048   ;;  %v2055_v0 = vmov 0.0|0.0   ;;  %vm2056_vm1 = vmmov 0   ;;  %v2057_v4 = vmov 0.0   ;;  %s2058_s24 = smov 64   ;;  %s2390_s1 = inlined_call_operand.vmem [shape: f32[16,128], index: 1, kind: input, shape index: {}]   ;;  %s2391_s2 = inlined_call_operand.vmem [shape: f32[32,128], index: 2, kind: input, shape index: {}]   ;;  %s2392_s0 = inlined_call_operand.vmem [shape: f32[16,16], index: 0, kind: input, shape index: {}]   ;;  %s2393_s4 = inlined_call_operand.vmem [shape: f32[2,32], index: 4, kind: input, shape index: {}]   ;;  %s2394_s3 = inlined_call_operand.vmem [shape: f32[1,128], index: 3, kind: input, shape index: {}]   ;;  %s2395_s5 = inlined_call_operand.vmem [shape: f32[2,32], index: 5, kind: input, shape index: {}]   ;;  %s2396_s6 = inlined_call_operand.vmem [shape: f32[32,128], index: 6, kind: input, shape index: {}]   ;;  %s2397_s7 = inlined_call_operand.vmem [shape: f32[32,128], index: 7, kind: input, shape index: {}]   ;;  %s2398_s9 = inlined_call_operand.vmem [shape: f32[2,32], index: 9, kind: input, shape index: {}]   ;;  %s2399_s10 = inlined_call_operand.vmem [shape: f32[2,32], index: 10, kind: input, shape index: {}]   ;;  %s2400_s8 = inlined_call_operand.vmem [shape: f32[1,128], index: 8, kind: input, shape index: {}]   ;;  %s2401_s11 = inlined_call_operand.vmem [shape: f32[32,128], index: 11, kind: input, shape index: {}]   ;;  %s2402_s12 = inlined_call_operand.vmem [shape: f32[1,128], index: 12, kind: input, shape index: {}]   ;;  %s2403_s13 = inlined_call_operand.vmem [shape: f32[8,128], index: 13, kind: output, shape index: {}]  }
   0x1   :  { %1866 = vmatprep.subr.bf16.mxu1 %v2055_v0  ;;  %v46_v1 = vld [vmem:[%s2390_s1] sm:$0xff]  ;;  %v47_v2 = vld [vmem:[%s2390_s1 + $0x8] sm:$0xff]  ;;  %1716 = vmatprep.mubr.msk.f32.mxu1 %vm2056_vm1, %v2057_v4  ;;  %v139_v9 = vld [vmem:[%s2391_s2 + $0x10] sm:$0xff]  ;;  %vm143_vm2 = vcmask 261120   ;;  %vm1189_vm3 = vcmask 254976  }
   0x2   :  { %v137_v3 = vld [vmem:[%s2391_s2] sm:$0xff]  ;;  %v1862_v5 = vpack.c.bf16 %v47_v2, %v46_v1  ;;  %v138_v6 = vld [vmem:[%s2391_s2 + $0x8] sm:$0xff]  ;;  %v140_v10 = vld [vmem:[%s2391_s2 + $0x18] sm:$0xff] }
   0x3   :  { %v44_v7 = vld [vmem:[%s2392_s0] sm:$0xff]  ;;  %v2148_v8 = vpack.c.bf16 %v138_v6, %v137_v3  ;;  %v45_v11 = vld [vmem:[%s2392_s0 + $0x8] sm:$0xff]  ;;  %v2161_v12 = vpack.c.bf16 %v140_v10, %v139_v9 }
   0x4   :  { %1705 = vmatprep.mubr.msk.f32.mxu0 %vm55_vm0, %v44_v7  ;;  %1863 = vmatprep.subr.bf16.mxu0 %v1862_v5  ;;  %v141_v13 = vld [vmem:[%s2393_s4] sm:$0x3] }
   0x5   :  { %1868 = vmatpush3.bf16.msra.mxu1 %v2148_v8  ;;  %1865 = vmatpush3.bf16.msra.mxu0 %v1862_v5  ;;  %v1596_v14 = vld [vmem:[%s2394_s3] ss:$0 sm:$0xff]  ;;  %s2059_s3 = smov 32  }
   0x6   :  { %1869 = vmatprep.subr.bf16.mxu1 %v2055_v0  ;;  %1872 = vmatprep.subr.bf16.mxu0 %v2055_v0  ;;  %v142_v23 = vld [vmem:[%s2395_s5] sm:$0x3] }
   0x8   :  { %1706 = vmatmul.mubr.msk.f32.vlgmr.msra.gmra.mrb[0].mxu0 %vm55_vm0, %v45_v11 }
   0x9   :  { %1871 = vmatpush3.bf16.msra.mxu1 %v2161_v12  ;;  %1874 = vmatpush3.bf16.msra.mxu0 %v2148_v8 }
   0xa   :  { %1875 = vmatprep.subr.bf16.mxu0 %v2055_v0  ;;  %1727 = vmatprep.mubr.msk.f32.mxu0 %vm2056_vm1, %v2057_v4 }
   0xb   :  { %1878 = vmatprep.subr.bf16.mxu1 %v2055_v0 }
   0xc   :  { %1717 = vmatmul.mubr.msk.f32.vlgmr.msra.gmra.mrb[0].mxu1 %vm143_vm2, %v141_v13 }
   0xd   :  { %1877 = vmatpush3.bf16.msra.mxu0 %v2161_v12  ;;  %1880 = vmatpush3.bf16.msra.mxu1 %v2148_v8 }
   0xe   :  { %1881 = vmatprep.subr.bf16.mxu1 %v2055_v0  ;;  %1738 = vmatprep.mubr.msk.f32.mxu1 %vm2056_vm1, %v2057_v4 }
   0xf   :  { %1884 = vmatprep.subr.bf16.mxu0 %v2055_v0 }
  0x11   :  { %1883 = vmatpush3.bf16.msra.mxu1 %v2161_v12 }
  0x12   :  { %1890 = vmatprep.subr.bf16.mxu1 %v2055_v0 }
  0xdb   :  { %v1707_v15 = vpop.f32.mrb[0].mxu0 }
  0xdc   :  { %v2187_v16 = vadd.f32 %v1707_v15, %v1596_v14  ;;  %v128_v17 = vpop.f32.mrb[1].mxu0 }
  0xdd   :  { %v2189_v18 = vadd.f32 %v1596_v14, %v128_v17 }
  0xdf   :  { %v213_v19 = vpop.f32.mrb[0].mxu1 }
  0xe0   :  { %v217_v20 = vadd.f32 %v213_v19, %v2189_v18  ;;  %v1718_v21 = vpop.f32.mrb[1].mxu1 }
  0xe2   :  { %1955 = vtanh.f32 %v217_v20  ;;  %v1600_v24 = vmul.f32 -1.442695, %v217_v20 }
  0xe4   :  { %1957 = vpow2.f32 %v1600_v24 }
  0xec   :  { %v1956_v22 = vpop.eup %1955 }
  0xed   :  { %231 = vrot.lane.b32.xlu0 %v1956_v22, %s2058_s24 }
  0xee   :  { %v1958_v25 = vpop.eup %1957 }
  0xef   :  { %v221_v26 = vadd.f32 1.0, %v1958_v25 }
  0xf1   :  { %226 = vrot.lane.b32.xlu0 %v142_v23, %s2059_s3  ;;  %1959 = vrcp.f32 %v221_v26 }
  0xfb   :  { %v1960_v27 = vpop.eup %1959 }
 0x15f   :  { %v232_v28 = vpop.permute.xlu0 %231 }
 0x160   :  { %v234_v29 = vmul.f32 %v1960_v27, %v232_v28 }
 0x162   :  { %236 = vrot.lane.b32.xlu1 %v234_v29, %s2059_s3 }
 0x163   :  { %v227_v30 = vpop.permute.xlu0 %226 }
 0x164   :  { %v229_v31 = vmul.f32 %v1960_v27, %v227_v30 }
 0x1d4   :  { %v237_v32 = vpop.permute.xlu1 %236 }
 0x1d5   :  { %v239_v33 = vadd.f32 %v237_v32, %v229_v31 }
 0x1d7   :  { %1961 = vtanh.f32 %v239_v33  ;;  %v333_v49 = vrot.slane %v239_v33, 6 }
 0x1e1   :  { %v1962_v34 = vpop.eup %1961 }
 0x1e2   :  { %242 = vrot.lane.b32.xlu1 %v1962_v34, %s2058_s24 }
 0x254   :  { %v243_v35 = vpop.permute.xlu1 %242 }
 0x255   :  { %v245_v36 = vmul.f32 %v1960_v27, %v243_v35 }
 0x257   :  { %247 = vrot.lane.b32.xlu0 %v245_v36, %s2059_s3 }
 0x2c9   :  { %v248_v37 = vpop.permute.xlu0 %247 }
 0x2ca   :  { %1728 = vmatmul.mubr.msk.f32.vlgmr.msra.gmra.mrb[2].mxu0 %vm143_vm2, %v248_v37 }
 0x2cb   :  { %1886 = vmatpush3.bf16.msra.mxu0 %v2148_v8  ;;  %1749 = vmatprep.mubr.msk.f32.mxu0 %vm2056_vm1, %v2057_v4 }
 0x2cc   :  { %1887 = vmatprep.subr.bf16.mxu0 %v2055_v0 }
 0x2cf   :  { %1889 = vmatpush3.bf16.msra.mxu0 %v2161_v12 }
 0x2d0   :  { %1896 = vmatprep.subr.bf16.mxu0 %v2055_v0 }
 0x39d   :  { %v317_v38 = vpop.f32.mrb[2].mxu0 }
 0x39e   :  { %v322_v39 = vrot.slane %v317_v38, 6  ;;  %v1729_v40 = vpop.f32.mrb[3].mxu0 }
 0x3a0   :  { %v324_v41 = vadd.f32 %v322_v39, %v2189_v18 }
 0x3a2   :  { %1963 = vtanh.f32 %v324_v41  ;;  %v1602_v43 = vmul.f32 -1.442695, %v324_v41 }
 0x3a4   :  { %1965 = vpow2.f32 %v1602_v43 }
 0x3ac   :  { %v1964_v42 = vpop.eup %1963 }
 0x3ad   :  { %337 = vrot.lane.b32.xlu1 %v1964_v42, %s2058_s24 }
 0x3ae   :  { %v1966_v44 = vpop.eup %1965 }
 0x3af   :  { %v328_v45 = vadd.f32 1.0, %v1966_v44 }
 0x3b1   :  { %1967 = vrcp.f32 %v328_v45 }
 0x3bb   :  { %v1968_v46 = vpop.eup %1967 }
 0x3bc   :  { %v335_v50 = vmul.f32 %v1968_v46, %v333_v49 }
 0x41f   :  { %v338_v47 = vpop.permute.xlu1 %337 }
 0x420   :  { %v340_v48 = vmul.f32 %v1968_v46, %v338_v47 }
 0x422   :  { %342 = vrot.lane.b32.xlu0 %v340_v48, %s2059_s3 }
 0x494   :  { %v343_v51 = vpop.permute.xlu0 %342 }
 0x495   :  { %v345_v52 = vadd.f32 %v343_v51, %v335_v50 }
 0x497   :  { %1969 = vtanh.f32 %v345_v52  ;;  %v440_v7 = vrot.slane %v345_v52, 6 }
 0x4a1   :  { %v1970_v53 = vpop.eup %1969 }
 0x4a2   :  { %348 = vrot.lane.b32.xlu1 %v1970_v53, %s2058_s24 }
 0x514   :  { %v349_v54 = vpop.permute.xlu1 %348 }
 0x515   :  { %v351_v55 = vmul.f32 %v1968_v46, %v349_v54 }
 0x517   :  { %v353_v56 = vrot.slane %v351_v55, 2 }
 0x519   :  { %354 = vrot.lane.b32.xlu0 %v353_v56, %s2059_s3 }
 0x58b   :  { %v355_v57 = vpop.permute.xlu0 %354 }
 0x58c   :  { %1739 = vmatmul.mubr.msk.f32.vlgmr.msra.gmra.mrb[2].mxu1 %vm143_vm2, %v355_v57 }
 0x58d   :  { %1892 = vmatpush3.bf16.msra.mxu1 %v2148_v8  ;;  %1760 = vmatprep.mubr.msk.f32.mxu1 %vm2056_vm1, %v2057_v4 }
 0x58e   :  { %1893 = vmatprep.subr.bf16.mxu1 %v2055_v0 }
 0x591   :  { %1895 = vmatpush3.bf16.msra.mxu1 %v2161_v12 }
 0x592   :  { %1902 = vmatprep.subr.bf16.mxu1 %v2055_v0 }
 0x65f   :  { %v424_v58 = vpop.f32.mrb[2].mxu1 }
 0x660   :  { %v429_v59 = vrot.slane %v424_v58, 4  ;;  %v1740_v60 = vpop.f32.mrb[3].mxu1 }
 0x662   :  { %v431_v61 = vadd.f32 %v429_v59, %v2189_v18 }
 0x664   :  { %1971 = vtanh.f32 %v431_v61  ;;  %v1604_v63 = vmul.f32 -1.442695, %v431_v61 }
 0x666   :  { %1973 = vpow2.f32 %v1604_v63 }
 0x66e   :  { %v1972_v62 = vpop.eup %1971 }
 0x66f   :  { %444 = vrot.lane.b32.xlu1 %v1972_v62, %s2058_s24 }
 0x670   :  { %v1974_v1 = vpop.eup %1973 }
 0x671   :  { %v435_v2 = vadd.f32 1.0, %v1974_v1 }
 0x673   :  { %1975 = vrcp.f32 %v435_v2 }
 0x67d   :  { %v1976_v3 = vpop.eup %1975 }
 0x67e   :  { %v442_v9 = vmul.f32 %v1976_v3, %v440_v7 }
 0x6e1   :  { %v445_v5 = vpop.permute.xlu1 %444 }
 0x6e2   :  { %v447_v6 = vmul.f32 %v1976_v3, %v445_v5 }
 0x6e4   :  { %449 = vrot.lane.b32.xlu0 %v447_v6, %s2059_s3 }
 0x756   :  { %v450_v10 = vpop.permute.xlu0 %449 }
 0x757   :  { %v452_v11 = vadd.f32 %v450_v10, %v442_v9 }
 0x759   :  { %1977 = vtanh.f32 %v452_v11  ;;  %v547_v31 = vrot.slane %v452_v11, 6 }
 0x763   :  { %v1978_v13 = vpop.eup %1977 }
 0x764   :  { %455 = vrot.lane.b32.xlu1 %v1978_v13, %s2058_s24 }
 0x7d6   :  { %v456_v14 = vpop.permute.xlu1 %455 }
 0x7d7   :  { %v458_v15 = vmul.f32 %v1976_v3, %v456_v14 }
 0x7d9   :  { %v460_v17 = vrot.slane %v458_v15, 4 }
 0x7db   :  { %461 = vrot.lane.b32.xlu0 %v460_v17, %s2059_s3 }
 0x84d   :  { %v462_v19 = vpop.permute.xlu0 %461 }
 0x84e   :  { %1750 = vmatmul.mubr.msk.f32.vlgmr.msra.gmra.mrb[4].mxu0 %vm143_vm2, %v462_v19 }
 0x84f   :  { %1898 = vmatpush3.bf16.msra.mxu0 %v2148_v8  ;;  %1771 = vmatprep.mubr.msk.f32.mxu0 %vm2056_vm1, %v2057_v4 }
 0x850   :  { %1899 = vmatprep.subr.bf16.mxu0 %v2055_v0 }
 0x853   :  { %1901 = vmatpush3.bf16.msra.mxu0 %v2161_v12 }
 0x854   :  { %1908 = vmatprep.subr.bf16.mxu0 %v2055_v0 }
 0x921   :  { %v531_v20 = vpop.f32.mrb[4].mxu0 }
 0x922   :  { %v536_v21 = vrot.slane %v531_v20, 2  ;;  %v1751_v22 = vpop.f32.mrb[5].mxu0 }
 0x924   :  { %v538_v23 = vadd.f32 %v536_v21, %v2189_v18 }
 0x926   :  { %1979 = vtanh.f32 %v538_v23  ;;  %v1606_v25 = vmul.f32 -1.442695, %v538_v23 }
 0x928   :  { %1981 = vpow2.f32 %v1606_v25 }
 0x930   :  { %v1980_v24 = vpop.eup %1979 }
 0x931   :  { %551 = vrot.lane.b32.xlu1 %v1980_v24, %s2058_s24 }
 0x932   :  { %v1982_v26 = vpop.eup %1981 }
 0x933   :  { %v542_v27 = vadd.f32 1.0, %v1982_v26 }
 0x935   :  { %1983 = vrcp.f32 %v542_v27 }
 0x93f   :  { %v1984_v28 = vpop.eup %1983 }
 0x940   :  { %v549_v32 = vmul.f32 %v1984_v28, %v547_v31 }
 0x9a3   :  { %v552_v29 = vpop.permute.xlu1 %551 }
 0x9a4   :  { %v554_v30 = vmul.f32 %v1984_v28, %v552_v29 }
 0x9a6   :  { %556 = vrot.lane.b32.xlu0 %v554_v30, %s2059_s3 }
 0xa18   :  { %v557_v33 = vpop.permute.xlu0 %556 }
 0xa19   :  { %v559_v34 = vadd.f32 %v557_v33, %v549_v32 }
 0xa1b   :  { %1985 = vtanh.f32 %v559_v34  ;;  %v651_v49 = vrot.slane %v559_v34, 6 }
 0xa25   :  { %v1986_v18 = vpop.eup %1985 }
 0xa26   :  { %562 = vrot.lane.b32.xlu1 %v1986_v18, %s2058_s24 }
 0xa98   :  { %v563_v35 = vpop.permute.xlu1 %562 }
 0xa99   :  { %v565_v36 = vmul.f32 %v1984_v28, %v563_v35 }
 0xa9b   :  { %v567_v37 = vrot.slane %v565_v36, 6 }
 0xa9d   :  { %568 = vrot.lane.b32.xlu0 %v567_v37, %s2059_s3 }
 0xb0f   :  { %v569_v38 = vpop.permute.xlu0 %568 }
 0xb10   :  { %1761 = vmatmul.mubr.msk.f32.vlgmr.msra.gmra.mrb[4].mxu1 %vm143_vm2, %v569_v38 }
 0xb11   :  { %1904 = vmatpush3.bf16.msra.mxu1 %v2148_v8  ;;  %1782 = vmatprep.mubr.msk.f32.mxu1 %vm2056_vm1, %v2057_v4 }
 0xb12   :  { %1905 = vmatprep.subr.bf16.mxu1 %v2055_v0 }
 0xb15   :  { %1907 = vmatpush3.bf16.msra.mxu1 %v2161_v12 }
 0xb16   :  { %1914 = vmatprep.subr.bf16.mxu1 %v2055_v0 }
 0xbe3   :  { %v638_v39 = vpop.f32.mrb[4].mxu1 }
 0xbe4   :  { %v642_v40 = vadd.f32 %v638_v39, %v2187_v16  ;;  %v1762_v41 = vpop.f32.mrb[5].mxu1 }
 0xbe6   :  { %1987 = vtanh.f32 %v642_v40  ;;  %v1608_v43 = vmul.f32 -1.442695, %v642_v40 }
 0xbe8   :  { %1989 = vpow2.f32 %v1608_v43 }
 0xbf0   :  { %v1988_v42 = vpop.eup %1987 }
 0xbf1   :  { %655 = vrot.lane.b32.xlu1 %v1988_v42, %s2058_s24 }
 0xbf2   :  { %v1990_v44 = vpop.eup %1989 }
 0xbf3   :  { %v646_v45 = vadd.f32 1.0, %v1990_v44 }
 0xbf5   :  { %1991 = vrcp.f32 %v646_v45 }
 0xbff   :  { %v1992_v46 = vpop.eup %1991 }
 0xc00   :  { %v653_v50 = vmul.f32 %v1992_v46, %v651_v49 }
 0xc63   :  { %v656_v47 = vpop.permute.xlu1 %655 }
 0xc64   :  { %v658_v48 = vmul.f32 %v1992_v46, %v656_v47 }
 0xc66   :  { %660 = vrot.lane.b32.xlu0 %v658_v48, %s2059_s3 }
 0xcd8   :  { %v661_v51 = vpop.permute.xlu0 %660 }
 0xcd9   :  { %v663_v52 = vadd.f32 %v661_v51, %v653_v50  ;;  %v991_v51 = vld [vmem:[%s2396_s6 + $0x8] sm:$0xff] }
 0xcdb   :  { %1993 = vtanh.f32 %v663_v52 }
 0xce5   :  { %v1994_v53 = vpop.eup %1993 }
 0xce6   :  { %666 = vrot.lane.b32.xlu1 %v1994_v53, %s2058_s24 }
 0xd58   :  { %v667_v54 = vpop.permute.xlu1 %666 }
 0xd59   :  { %v669_v55 = vmul.f32 %v1992_v46, %v667_v54  ;;  %v1078_v54 = vld [vmem:[%s2397_s7 + $0x8] sm:$0xff] }
 0xd5b   :  { %671 = vrot.lane.b32.xlu0 %v669_v55, %s2059_s3  ;;  %v992_v55 = vld [vmem:[%s2396_s6 + $0x10] sm:$0xff] }
 0xdcd   :  { %v672_v56 = vpop.permute.xlu0 %671 }
 0xdce   :  { %1772 = vmatmul.mubr.msk.f32.vlgmr.msra.gmra.mrb[6].mxu0 %vm143_vm2, %v672_v56  ;;  %v993_v56 = vld [vmem:[%s2396_s6 + $0x18] sm:$0xff] }
 0xdcf   :  { %1910 = vmatpush3.bf16.msra.mxu0 %v2148_v8  ;;  %1793 = vmatprep.mubr.msk.f32.mxu0 %vm2056_vm1, %v2057_v4 }
 0xdd0   :  { %1911 = vmatprep.subr.bf16.mxu0 %v2055_v0 }
 0xdd3   :  { %1913 = vmatpush3.bf16.msra.mxu0 %v2161_v12  ;;  %v757_v12 = vrot.slane %v663_v52, 6  ;;  %v1077_v52 = vld [vmem:[%s2397_s7] sm:$0xff] }
 0xdd4   :  { %1920 = vmatprep.subr.bf16.mxu0 %v2055_v0 }
 0xea1   :  { %v741_v57 = vpop.f32.mrb[6].mxu0 }
 0xea2   :  { %v746_v58 = vrot.slane %v741_v57, 6  ;;  %v1773_v59 = vpop.f32.mrb[7].mxu0  ;;  %v2292_v57 = vpack.c.bf16 %v1078_v54, %v1077_v52 }
 0xea3   :  { %v1080_v59 = vld [vmem:[%s2397_s7 + $0x18] sm:$0xff] }
 0xea4   :  { %v748_v60 = vadd.f32 %v746_v58, %v2187_v16  ;;  %v1079_v58 = vld [vmem:[%s2397_s7 + $0x10] sm:$0xff] }
 0xea6   :  { %1995 = vtanh.f32 %v748_v60  ;;  %v1610_v62 = vmul.f32 -1.442695, %v748_v60  ;;  %v1918_v60 = vpack.c.bf16 %v993_v56, %v992_v55 }
 0xea8   :  { %1997 = vpow2.f32 %v1610_v62 }
 0xeb0   :  { %v1996_v61 = vpop.eup %1995 }
 0xeb1   :  { %761 = vrot.lane.b32.xlu1 %v1996_v61, %s2058_s24  ;;  %v2302_v61 = vpack.c.bf16 %v1080_v59, %v1079_v58 }
 0xeb2   :  { %v1998_v8 = vpop.eup %1997 }
 0xeb3   :  { %v752_v63 = vadd.f32 1.0, %v1998_v8  ;;  %v1081_v8 = vld [vmem:[%s2398_s9] sm:$0x3] }
 0xeb5   :  { %1999 = vrcp.f32 %v752_v63 }
 0xebf   :  { %v2000_v1 = vpop.eup %1999 }
 0xec0   :  { %v759_v5 = vmul.f32 %v2000_v1, %v757_v12 }
 0xf23   :  { %v762_v2 = vpop.permute.xlu1 %761 }
 0xf24   :  { %v764_v3 = vmul.f32 %v2000_v1, %v762_v2 }
 0xf26   :  { %766 = vrot.lane.b32.xlu0 %v764_v3, %s2059_s3  ;;  %v1082_v3 = vld [vmem:[%s2399_s10] sm:$0x3] }
 0xf98   :  { %v767_v6 = vpop.permute.xlu0 %766 }
 0xf99   :  { %v769_v7 = vadd.f32 %v767_v6, %v759_v5 }
 0xf9b   :  { %2001 = vtanh.f32 %v769_v7  ;;  %v864_v28 = vrot.slane %v769_v7, 6  ;;  %v1615_v7 = vld [vmem:[%s2400_s8] ss:$0 sm:$0xff] }
 0xfa5   :  { %v2002_v9 = vpop.eup %2001 }
 0xfa6   :  { %772 = vrot.lane.b32.xlu1 %v2002_v9, %s2058_s24 }
0x1018   :  { %v773_v10 = vpop.permute.xlu1 %772 }
0x1019   :  { %v775_v11 = vmul.f32 %v2000_v1, %v773_v10 }
0x101b   :  { %v777_v13 = vrot.slane %v775_v11, 2 }
0x101d   :  { %778 = vrot.lane.b32.xlu0 %v777_v13, %s2059_s3 }
0x108f   :  { %v779_v14 = vpop.permute.xlu0 %778 }
0x1090   :  { %1783 = vmatmul.mubr.msk.f32.vlgmr.msra.gmra.mrb[6].mxu1 %vm143_vm2, %v779_v14 }
0x1091   :  { %1804 = vmatprep.mubr.msk.f32.mxu1 %vm2056_vm1, %v2057_v4 }
0x1163   :  { %v848_v15 = vpop.f32.mrb[6].mxu1 }
0x1164   :  { %v853_v17 = vrot.slane %v848_v15, 4  ;;  %v1784_v19 = vpop.f32.mrb[7].mxu1 }
0x1166   :  { %v855_v20 = vadd.f32 %v853_v17, %v2187_v16 }
0x1168   :  { %2003 = vtanh.f32 %v855_v20  ;;  %v1612_v22 = vmul.f32 -1.442695, %v855_v20 }
0x116a   :  { %2005 = vpow2.f32 %v1612_v22 }
0x1172   :  { %v2004_v21 = vpop.eup %2003 }
0x1173   :  { %868 = vrot.lane.b32.xlu1 %v2004_v21, %s2058_s24 }
0x1174   :  { %v2006_v23 = vpop.eup %2005 }
0x1175   :  { %v859_v24 = vadd.f32 1.0, %v2006_v23 }
0x1177   :  { %2007 = vrcp.f32 %v859_v24 }
0x1181   :  { %v2008_v25 = vpop.eup %2007 }
0x1182   :  { %v866_v29 = vmul.f32 %v2008_v25, %v864_v28 }
0x11e5   :  { %v869_v26 = vpop.permute.xlu1 %868 }
0x11e6   :  { %v871_v27 = vmul.f32 %v2008_v25, %v869_v26 }
0x11e8   :  { %873 = vrot.lane.b32.xlu0 %v871_v27, %s2059_s3 }
0x125a   :  { %v874_v30 = vpop.permute.xlu0 %873 }
0x125b   :  { %v876_v31 = vadd.f32 %v874_v30, %v866_v29 }
0x125d   :  { %2009 = vtanh.f32 %v876_v31  ;;  %v971_v47 = vrot.slane %v876_v31, 6 }
0x1267   :  { %v2010_v32 = vpop.eup %2009 }
0x1268   :  { %879 = vrot.lane.b32.xlu1 %v2010_v32, %s2058_s24 }
0x12da   :  { %v880_v33 = vpop.permute.xlu1 %879 }
0x12db   :  { %v882_v34 = vmul.f32 %v2008_v25, %v880_v33 }
0x12dd   :  { %v884_v18 = vrot.slane %v882_v34, 4 }
0x12df   :  { %885 = vrot.lane.b32.xlu0 %v884_v18, %s2059_s3 }
0x1351   :  { %v886_v35 = vpop.permute.xlu0 %885 }
0x1352   :  { %1794 = vmatmul.mubr.msk.f32.vlgmr.msra.gmra.mrb[8].mxu0 %vm143_vm2, %v886_v35 }
0x1353   :  { %1815 = vmatprep.mubr.msk.f32.mxu0 %vm2056_vm1, %v2057_v4  ;;  %1922 = vmatpush3.bf16.msra.mxu0 %v2292_v57 }
0x1354   :  { %1923 = vmatprep.subr.bf16.mxu0 %v2055_v0 }
0x1357   :  { %1925 = vmatpush3.bf16.msra.mxu0 %v2302_v61 }
0x1358   :  { %1932 = vmatprep.subr.bf16.mxu0 %v2055_v0 }
0x135a   :  { %1816 = vmatmul.mubr.msk.f32.vlgmr.msra.gmra.mrb[10].mxu0 %vm143_vm2, %v1081_v8 }
0x135b   :  { %1934 = vmatpush3.bf16.msra.mxu0 %v2292_v57  ;;  %1837 = vmatprep.mubr.msk.f32.mxu0 %vm2056_vm1, %v2057_v4 }
0x135c   :  { %1935 = vmatprep.subr.bf16.mxu0 %v2055_v0 }
0x135f   :  { %1937 = vmatpush3.bf16.msra.mxu0 %v2302_v61 }
0x1360   :  { %1944 = vmatprep.subr.bf16.mxu0 %v2055_v0 }
0x1425   :  { %v955_v36 = vpop.f32.mrb[8].mxu0 }
0x1426   :  { %v960_v37 = vrot.slane %v955_v36, 2  ;;  %v1795_v38 = vpop.f32.mrb[9].mxu0 }
0x1428   :  { %v962_v39 = vadd.f32 %v960_v37, %v2187_v16  ;;  %v990_v16 = vld [vmem:[%s2396_s6] sm:$0xff] }
0x1429   :  { %v1915_v53 = vpack.c.bf16 %v991_v51, %v990_v16 }
0x142a   :  { %2011 = vtanh.f32 %v962_v39  ;;  %v1614_v41 = vmul.f32 -1.442695, %v962_v39 }
0x142b   :  { %1916 = vmatpush3.bf16.msra.mxu1 %v1915_v53 }
0x142c   :  { %2013 = vpow2.f32 %v1614_v41  ;;  %1917 = vmatprep.subr.bf16.mxu1 %v2055_v0 }
0x142d   :  { %v1152_v5 = vpop.f32.mrb[10].mxu0 }
0x142e   :  { %v1817_v6 = vpop.f32.mrb[11].mxu0 }
0x142f   :  { %1919 = vmatpush3.bf16.msra.mxu1 %v1918_v60 }
0x1430   :  { %1926 = vmatprep.subr.bf16.mxu1 %v2055_v0 }
0x1434   :  { %v2012_v40 = vpop.eup %2011 }
0x1435   :  { %975 = vrot.lane.b32.xlu1 %v2012_v40, %s2058_s24 }
0x1436   :  { %v2014_v42 = vpop.eup %2013 }
0x1437   :  { %v966_v43 = vadd.f32 1.0, %v2014_v42 }
0x1439   :  { %2015 = vrcp.f32 %v966_v43 }
0x1443   :  { %v2016_v44 = vpop.eup %2015 }
0x1444   :  { %v973_v48 = vmul.f32 %v2016_v44, %v971_v47 }
0x14a7   :  { %v976_v45 = vpop.permute.xlu1 %975 }
0x14a8   :  { %v978_v46 = vmul.f32 %v2016_v44, %v976_v45 }
0x14aa   :  { %980 = vrot.lane.b32.xlu0 %v978_v46, %s2059_s3 }
0x151c   :  { %v981_v49 = vpop.permute.xlu0 %980 }
0x151d   :  { %v983_v50 = vadd.f32 %v981_v49, %v973_v48 }
0x151f   :  { %2017 = vtanh.f32 %v983_v50 }
0x1529   :  { %v2018_v62 = vpop.eup %2017 }
0x152a   :  { %986 = vrot.lane.b32.xlu1 %v2018_v62, %s2058_s24 }
0x159c   :  { %v987_v63 = vpop.permute.xlu1 %986 }
0x159d   :  { %v989_v1 = vmul.f32 %v2016_v44, %v987_v63 }
0x159f   :  { %v1002_v2 = vrot.slane %v989_v1, 6 }
0x15a1   :  { %1003 = vrot.lane.b32.xlu0 %v1002_v2, %s2059_s3 }
0x15a5   :  { %1165 = vrot.lane.b32.xlu0 %v1082_v3, %s2059_s3 }
0x1613   :  { %v1004_v12 = vpop.permute.xlu0 %1003 }
0x1614   :  { %1805 = vmatmul.mubr.msk.f32.vlgmr.msra.gmra.mrb[8].mxu1 %vm143_vm2, %v1004_v12 }
0x1615   :  { %1928 = vmatpush3.bf16.msra.mxu1 %v2292_v57  ;;  %1826 = vmatprep.mubr.msk.f32.mxu1 %vm2056_vm1, %v2057_v4 }
0x1616   :  { %1929 = vmatprep.subr.bf16.mxu1 %v2055_v0 }
0x1617   :  { %v1166_v23 = vpop.permute.xlu0 %1165 }
0x1619   :  { %1931 = vmatpush3.bf16.msra.mxu1 %v2302_v61 }
0x161a   :  { %1938 = vmatprep.subr.bf16.mxu1 %v2055_v0 }
0x16e7   :  { %v1073_v9 = vpop.f32.mrb[8].mxu1 }
0x16e8   :  { %v2334_v10 = vadd.f32 %v1615_v7, %v1073_v9  ;;  %v1806_v11 = vpop.f32.mrb[9].mxu1 }
0x16ea   :  { %v1156_v13 = vadd.f32 %v1152_v5, %v2334_v10 }
0x16ec   :  { %2019 = vtanh.f32 %v1156_v13  ;;  %v1618_v15 = vmul.f32 -1.442695, %v1156_v13 }
0x16ee   :  { %2021 = vpow2.f32 %v1618_v15  ;;  %v1499_v15 = vld [vmem:[%s2401_s11 + $0x8] sm:$0xff] }
0x16f6   :  { %v2020_v14 = vpop.eup %2019 }
0x16f7   :  { %1170 = vrot.lane.b32.xlu1 %v2020_v14, %s2058_s24  ;;  %v1498_v14 = vld [vmem:[%s2401_s11] sm:$0xff] }
0x16f8   :  { %v2022_v17 = vpop.eup %2021 }
0x16f9   :  { %v1160_v19 = vadd.f32 1.0, %v2022_v17  ;;  %v1945_v17 = vpack.c.bf16 %v1499_v15, %v1498_v14 }
0x16fb   :  { %2023 = vrcp.f32 %v1160_v19  ;;  %v1500_v19 = vld [vmem:[%s2401_s11 + $0x10] sm:$0xff] }
0x1705   :  { %v2024_v20 = vpop.eup %2023 }
0x1706   :  { %v1168_v24 = vmul.f32 %v2024_v20, %v1166_v23 }
0x1769   :  { %v1171_v21 = vpop.permute.xlu1 %1170 }
0x176a   :  { %v1173_v22 = vmul.f32 %v2024_v20, %v1171_v21 }
0x176c   :  { %1175 = vrot.lane.b32.xlu1 %v1173_v22, %s2059_s3 }
0x17de   :  { %v1176_v25 = vpop.permute.xlu1 %1175 }
0x17df   :  { %v1178_v26 = vadd.f32 %v1176_v25, %v1168_v24 }
0x17e1   :  { %2025 = vtanh.f32 %v1178_v26 }
0x17eb   :  { %v2026_v27 = vpop.eup %2025 }
0x17ec   :  { %1181 = vrot.lane.b32.xlu0 %v2026_v27, %s2058_s24 }
0x185e   :  { %v1182_v28 = vpop.permute.xlu0 %1181 }
0x185f   :  { %v1184_v29 = vmul.f32 %v2024_v20, %v1182_v28  ;;  %v1501_v20 = vld [vmem:[%s2401_s11 + $0x18] sm:$0xff] }
0x1860   :  { %v1948_v21 = vpack.c.bf16 %v1501_v20, %v1500_v19 }
0x1861   :  { %1186 = vrot.lane.b32.xlu1 %v1184_v29, %s2059_s3 }
0x18d3   :  { %v1187_v30 = vpop.permute.xlu1 %1186 }
0x18d4   :  { %1190 = vst.msk [vmem:[#allocation2] sm:$0x3] %vm1189_vm3, %v1187_v30  ;;  %1827 = vmatmul.mubr.msk.f32.vlgmr.msra.gmra.mrb[10].mxu1 %vm143_vm2, %v1187_v30 }
0x18d5   :  { %1940 = vmatpush3.bf16.msra.mxu1 %v2292_v57  ;;  %1848 = vmatprep.mubr.msk.f32.mxu1 %vm2056_vm1, %v2057_v4 }
0x18d6   :  { %1941 = vmatprep.subr.bf16.mxu1 %v2055_v0 }
0x18d9   :  { %1943 = vmatpush3.bf16.msra.mxu1 %v2302_v61 }
0x19a7   :  { %v1259_v31 = vpop.f32.mrb[10].mxu1 }
0x19a8   :  { %v1263_v32 = vadd.f32 %v1259_v31, %v2334_v10  ;;  %v1828_v33 = vpop.f32.mrb[11].mxu1 }
0x19aa   :  { %2027 = vtanh.f32 %v1263_v32  ;;  %v1620_v18 = vmul.f32 -1.442695, %v1263_v32 }
0x19ac   :  { %2029 = vpow2.f32 %v1620_v18 }
0x19b4   :  { %v2028_v34 = vpop.eup %2027 }
0x19b5   :  { %1273 = vrot.lane.b32.xlu0 %v2028_v34, %s2058_s24 }
0x19b6   :  { %v2030_v35 = vpop.eup %2029 }
0x19b7   :  { %v1267_v36 = vadd.f32 1.0, %v2030_v35 }
0x19b9   :  { %2031 = vrcp.f32 %v1267_v36 }
0x19c3   :  { %v2032_v37 = vpop.eup %2031 }
0x19c4   :  { %v1271_v40 = vmul.f32 %v2032_v37, %v1178_v26  ;;  %v1625_v26 = vld [vmem:[%s2402_s12] ss:$0 sm:$0xff] }
0x1a27   :  { %v1274_v38 = vpop.permute.xlu0 %1273 }
0x1a28   :  { %v1276_v39 = vmul.f32 %v2032_v37, %v1274_v38 }
0x1a2a   :  { %1278 = vrot.lane.b32.xlu1 %v1276_v39, %s2059_s3 }
0x1a9c   :  { %v1279_v41 = vpop.permute.xlu1 %1278 }
0x1a9d   :  { %v1281_v42 = vadd.f32 %v1279_v41, %v1271_v40 }
0x1a9f   :  { %2033 = vtanh.f32 %v1281_v42 }
0x1aa9   :  { %v2034_v43 = vpop.eup %2033 }
0x1aaa   :  { %1284 = vrot.lane.b32.xlu0 %v2034_v43, %s2058_s24 }
0x1b1c   :  { %v1285_v44 = vpop.permute.xlu0 %1284 }
0x1b1d   :  { %v1287_v45 = vmul.f32 %v2032_v37, %v1285_v44 }
0x1b1f   :  { %1289 = vrot.lane.b32.xlu1 %v1287_v45, %s2059_s3 }
0x1b91   :  { %v1290_v46 = vpop.permute.xlu1 %1289 }
0x1b92   :  { %1292 = vst.msk [vmem:[#allocation2 + $0x2] sm:$0x3] %vm1189_vm3, %v1290_v46  ;;  %1838 = vmatmul.mubr.msk.f32.vlgmr.msra.gmra.mrb[12].mxu0 %vm143_vm2, %v1290_v46 }
0x1b93   :  { %1859 = vmatprep.mubr.msk.f32.mxu0 %vm2056_vm1, %v2057_v4  ;;  %1946 = vmatpush3.bf16.msra.mxu0 %v1945_v17 }
0x1b94   :  { %1947 = vmatprep.subr.bf16.mxu0 %v2055_v0 }
0x1b97   :  { %1949 = vmatpush3.bf16.msra.mxu0 %v1948_v21 }
0x1c65   :  { %v1361_v47 = vpop.f32.mrb[12].mxu0 }
0x1c66   :  { %v1365_v48 = vadd.f32 %v1361_v47, %v2334_v10  ;;  %v1839_v49 = vpop.f32.mrb[13].mxu0 }
0x1c68   :  { %2035 = vtanh.f32 %v1365_v48  ;;  %v1622_v16 = vmul.f32 -1.442695, %v1365_v48 }
0x1c6a   :  { %2037 = vpow2.f32 %v1622_v16 }
0x1c72   :  { %v2036_v50 = vpop.eup %2035 }
0x1c73   :  { %1375 = vrot.lane.b32.xlu0 %v2036_v50, %s2058_s24 }
0x1c74   :  { %v2038_v51 = vpop.eup %2037 }
0x1c75   :  { %v1369_v52 = vadd.f32 1.0, %v2038_v51 }
0x1c77   :  { %2039 = vrcp.f32 %v1369_v52 }
0x1c81   :  { %v2040_v53 = vpop.eup %2039 }
0x1c82   :  { %v1373_v56 = vmul.f32 %v2040_v53, %v1281_v42 }
0x1ce5   :  { %v1376_v54 = vpop.permute.xlu0 %1375 }
0x1ce6   :  { %v1378_v55 = vmul.f32 %v2040_v53, %v1376_v54 }
0x1ce8   :  { %1380 = vrot.lane.b32.xlu1 %v1378_v55, %s2059_s3 }
0x1d5a   :  { %v1381_v4 = vpop.permute.xlu1 %1380 }
0x1d5b   :  { %v1383_v57 = vadd.f32 %v1381_v4, %v1373_v56 }
0x1d5d   :  { %2041 = vtanh.f32 %v1383_v57 }
0x1d67   :  { %v2042_v58 = vpop.eup %2041 }
0x1d68   :  { %1386 = vrot.lane.b32.xlu0 %v2042_v58, %s2058_s24 }
0x1dda   :  { %v1387_v59 = vpop.permute.xlu0 %1386 }
0x1ddb   :  { %v1389_v60 = vmul.f32 %v2040_v53, %v1387_v59 }
0x1ddd   :  { %1391 = vrot.lane.b32.xlu1 %v1389_v60, %s2059_s3 }
0x1e4f   :  { %v1392_v61 = vpop.permute.xlu1 %1391 }
0x1e50   :  { %1394 = vst.msk [vmem:[#allocation2 + $0x4] sm:$0x3] %vm1189_vm3, %v1392_v61  ;;  %1849 = vmatmul.mubr.msk.f32.vlgmr.msra.gmra.mrb[12].mxu1 %vm143_vm2, %v1392_v61 }
0x1f23   :  { %v1463_v62 = vpop.f32.mrb[12].mxu1 }
0x1f24   :  { %v1467_v8 = vadd.f32 %v1463_v62, %v2334_v10  ;;  %v1850_v63 = vpop.f32.mrb[13].mxu1 }
0x1f26   :  { %2043 = vtanh.f32 %v1467_v8  ;;  %v1624_v2 = vmul.f32 -1.442695, %v1467_v8 }
0x1f28   :  { %2045 = vpow2.f32 %v1624_v2 }
0x1f30   :  { %v2044_v1 = vpop.eup %2043 }
0x1f31   :  { %1477 = vrot.lane.b32.xlu0 %v2044_v1, %s2058_s24 }
0x1f32   :  { %v2046_v3 = vpop.eup %2045 }
0x1f33   :  { %v1471_v12 = vadd.f32 1.0, %v2046_v3 }
0x1f35   :  { %2047 = vrcp.f32 %v1471_v12 }
0x1f3f   :  { %v2048_v5 = vpop.eup %2047 }
0x1f40   :  { %v1475_v9 = vmul.f32 %v2048_v5, %v1383_v57 }
0x1fa3   :  { %v1478_v6 = vpop.permute.xlu0 %1477 }
0x1fa4   :  { %v1480_v7 = vmul.f32 %v2048_v5, %v1478_v6 }
0x1fa6   :  { %1482 = vrot.lane.b32.xlu1 %v1480_v7, %s2059_s3 }
0x2018   :  { %v1483_v11 = vpop.permute.xlu1 %1482 }
0x2019   :  { %v1485_v13 = vadd.f32 %v1483_v11, %v1475_v9 }
0x201b   :  { %2049 = vtanh.f32 %v1485_v13 }
0x2025   :  { %v2050_v10 = vpop.eup %2049 }
0x2026   :  { %1488 = vrot.lane.b32.xlu0 %v2050_v10, %s2058_s24 }
0x2098   :  { %v1489_v22 = vpop.permute.xlu0 %1488 }
0x2099   :  { %v1491_v23 = vmul.f32 %v2048_v5, %v1489_v22 }
0x209b   :  { %1493 = vrot.lane.b32.xlu1 %v1491_v23, %s2059_s3 }
0x210d   :  { %v1494_v24 = vpop.permute.xlu1 %1493 }
0x210e   :  { %1496 = vst.msk [vmem:[#allocation2 + $0x6] sm:$0x3] %vm1189_vm3, %v1494_v24 }
0x2115   :  { %v1497_v25 = vld [vmem:[#allocation2] sm:$0xff] }
0x2116   :  { %1860 = vmatmul.mubr.msk.f32.vlgmr.msra.gmra.mrb[14].mxu0 %vm143_vm2, %v1497_v25 }
0x21e9   :  { %v1578_v27 = vpop.f32.mrb[14].mxu0 }
0x21ea   :  { %v1579_v28 = vadd.f32 %v1625_v26, %v1578_v27  ;;  %v1861_v29 = vpop.f32.mrb[15].mxu0 }
0x21ec   :  { %1582 = vmax.xlane.f32.xlu0 %v1579_v28 }
0x2279   :  { %v1583_v0 = vpop.xlane.xlu0 %1582 }
0x227a   :  { %v1584_v30 = vsub.f32 %v1579_v28, %v1583_v0 }
0x227c   :  { %v1585_v31 = vmul.f32 1.442695, %v1584_v30 }
0x227e   :  { %2051 = vpow2.f32 %v1585_v31 }
0x2288   :  { %v2052_v32 = vpop.eup %2051 }
0x2289   :  { %1587 = vadd.xlane.f32.xlu1 %v2052_v32 }
0x2316   :  { %v1588_v33 = vpop.xlane.xlu1 %1587 }
0x2317   :  { %2053 = vrcp.f32 %v1588_v33 }
0x2321   :  { %v2054_v34 = vpop.eup %2053 }
0x2322   :  { %v1590_v18 = vmul.f32 %v2054_v34, %v2052_v32 }
0x2324   :  { %1591 = vst [vmem:[%s2403_s13] sm:$0xff] %v1590_v18 }

</bundles_post_ra>
